<compile_context>
chip_gen: v6e
topology: v6e:2x2x1
jax: 0.10.0
libtpu: 0.0.40
codegen_flags: <defaults>
</compile_context>

<pallas_src>
import jax
import jax.numpy as jnp
import numpy as np
from jax.experimental import pallas as pl
from jax.experimental.pallas import tpu as pltpu

HIDDEN = 20          # hidden_layers_zer = [20, 20]
HIDDEN_PAD = 32      # padded hidden so 4*H = 128 lanes exactly
GATES = 4 * HIDDEN_PAD          # 128
W_ROWS = 3 * HIDDEN_PAD + 8     # 104 rows (96 weight rows + 4 vector rows + pad)

# PyTorch LSTMCell gate order: i, f, g, o.  Fold sigmoid(x)=0.5*(1+tanh(x/2))
# by pre-scaling the i/f/o gate pre-activations with 0.5 at pack time.
_GATE_SCALE = (0.5, 0.5, 1.0, 0.5)


# ---------------------------------------------------------------------------
# Kernel
# ---------------------------------------------------------------------------
def _dm_optimizer_kernel(grads_ref, state_ref, w_ref, bout_ref,
                         out_ref, state_out_ref):
    HP = HIDDEN_PAD

    grads = grads_ref[...]                    # (tile, 1)
    state = state_ref[...]                    # (tile, 128) = [h0 | h1 | c0 | c1]
    h0 = state[:, 0 * HP:1 * HP]
    h1 = state[:, 1 * HP:2 * HP]
    c0 = state[:, 2 * HP:3 * HP]
    c1 = state[:, 3 * HP:4 * HP]

    # Packed weight slab (constant index_map -> VMEM resident across steps).
    whh0 = w_ref[0 * HP:1 * HP, :]            # (32, 128)   W_hh0^T (gate-padded, i/f/o pre-scaled)
    w1cat = w_ref[1 * HP:3 * HP, :]           # (64, 128)   [W_ih1^T ; W_hh1^T]
    b0 = w_ref[3 * HP + 0:3 * HP + 1, :]      # (1, 128)    b_ih0 + b_hh0
    b1 = w_ref[3 * HP + 1:3 * HP + 2, :]      # (1, 128)    b_ih1 + b_hh1
    wih0 = w_ref[3 * HP + 2:3 * HP + 3, :]    # (1, 128)    W_ih0^T (input size 1)
    wout = w_ref[3 * HP + 3:3 * HP + 4, 0:HP]  # (1, 32)     W_out (padded, unscaled)

    def lstm_gates(pre, c):
        # `pre` already carries the 0.5 scale on the sigmoid gates (i, f, o),
        # so ONE full-width tanh pass covers all four gates on the EUP.
        t = jnp.tanh(pre)
        i_g = 0.5 * (t[:, 0 * HP:1 * HP] + 1.0)   # sigmoid(pre_i)
        f_g = 0.5 * (t[:, 1 * HP:2 * HP] + 1.0)   # sigmoid(pre_f)
        g_g = t[:, 2 * HP:3 * HP]                  # tanh(pre_g)
        o_g = 0.5 * (t[:, 3 * HP:4 * HP] + 1.0)   # sigmoid(pre_o)
        c_new = f_g * c + i_g * g_g
        h_new = o_g * jnp.tanh(c_new)
        return h_new, c_new

    # --- Cell 0: input size 1 -> K=1 matmul replaced by VPU broadcast multiply.
    pre0 = (grads * wih0
            + jnp.dot(h0, whh0, preferred_element_type=jnp.float32)
            + b0)
    h0n, c0n = lstm_gates(pre0, c0)

    # --- Cell 1: fused [x | h] @ [W_ih ; W_hh] (single MXU pass, K = 64).
    x1 = jnp.concatenate([h0n, h1], axis=-1)  # (tile, 64)
    pre1 = jnp.dot(x1, w1cat, preferred_element_type=jnp.float32) + b1
    h1n, c1n = lstm_gates(pre1, c1)

    # --- Linear(20 -> 1): VPU multiply + lane reduction; b_out read from SMEM.
    out_ref[...] = jnp.sum(h1n * wout, axis=-1, keepdims=True) + bout_ref[0]

    # Lane-dense packed state output (aliased with the input state slab).
    state_out_ref[...] = jnp.concatenate([h0n, h1n, c0n, c1n], axis=-1)


# ---------------------------------------------------------------------------
# Packing helpers
# ---------------------------------------------------------------------------
def _round_up(x, m):
    return (x + m - 1) // m * m


def _pad_scale_gate_cols(w):
    """(..., 4*HIDDEN) gate-blocked -> (..., 4*HIDDEN_PAD): zero-pad each gate
    block to HIDDEN_PAD lanes and fold the 0.5 sigmoid pre-activation scale."""
    H, HP = HIDDEN, HIDDEN_PAD
    blocks = []
    for g in range(4):
        blk = w[..., g * H:(g + 1) * H] * _GATE_SCALE[g]
        blocks.append(jnp.pad(blk, [(0, 0)] * (w.ndim - 1) + [(0, HP - H)]))
    return jnp.concatenate(blocks, axis=-1)


def pack_params(params):
    """Pack all weights/biases into one (W_ROWS, 128) f32 slab + (1,) b_out."""
    H, HP = HIDDEN, HIDDEN_PAD
    f32 = jnp.float32

    def pad_rows(w):
        return jnp.pad(w, ((0, HP - w.shape[0]), (0, 0)))

    whh0 = pad_rows(_pad_scale_gate_cols(params["w_hh0"].T.astype(f32)))   # (32,128)
    wih1 = pad_rows(_pad_scale_gate_cols(params["w_ih1"].T.astype(f32)))   # (32,128)
    whh1 = pad_rows(_pad_scale_gate_cols(params["w_hh1"].T.astype(f32)))   # (32,128)
    b0 = _pad_scale_gate_cols((params["b_ih0"] + params["b_hh0"]).astype(f32)[None, :])
    b1 = _pad_scale_gate_cols((params["b_ih1"] + params["b_hh1"]).astype(f32)[None, :])
    wih0 = _pad_scale_gate_cols(params["w_ih0"].T.astype(f32))             # (1,128)
    wout = jnp.pad(params["w_out"].astype(f32), ((0, 0), (0, GATES - H)))  # (1,128)

    wslab = jnp.concatenate([whh0, wih1, whh1, b0, b1, wih0, wout], axis=0)
    wslab = jnp.pad(wslab, ((0, W_ROWS - wslab.shape[0]), (0, 0)))         # (104,128)
    bout = params["b_out"].astype(f32).reshape(1)
    return wslab, bout


def pack_state(hidden, cell, n_pad=None):
    """(h0,h1),(c0,c1) each (N, 20) -> persistent packed (n_pad, 128) slab.
    Padded lanes/rows are zero and stay zero through the LSTM recurrence."""
    n = hidden[0].shape[0]
    if n_pad is None:
        n_pad = _round_up(n, 8)

    def pad(a):
        return jnp.pad(a.astype(jnp.float32),
                       ((0, n_pad - n), (0, HIDDEN_PAD - HIDDEN)))

    return jnp.concatenate([pad(hidden[0]), pad(hidden[1]),
                            pad(cell[0]), pad(cell[1])], axis=-1)


def unpack_state(state, n):
    """Packed (n_pad, 128) slab -> ((h0, h1), (c0, c1)), each (n, 20)."""
    H, HP = HIDDEN, HIDDEN_PAD
    h0 = state[:n, 0 * HP:0 * HP + H]
    h1 = state[:n, 1 * HP:1 * HP + H]
    c0 = state[:n, 2 * HP:2 * HP + H]
    c1 = state[:n, 3 * HP:3 * HP + H]
    return (h0, h1), (c0, c1)


def _choose_tile(n, tile_n=4096):
    """Row tile: big enough to amortize ~0.35 us/step, small enough that the
    grid has >= 2 steps for N >= 2048 (feeds both v7x TensorCores)."""
    tile_n = _round_up(max(8, min(int(tile_n), 8192)), 8)
    if n >= 2048:
        half = _round_up(-(-n // 2), 8)
        return min(tile_n, half)
    return min(tile_n, _round_up(max(n, 1), 8))


# ---------------------------------------------------------------------------
# Core step on the persistent packed state (recommended training-loop API)
# ---------------------------------------------------------------------------
def dm_optimizer_step(grads, state, wslab, bout, *, tile):
    """One optimizer step.
    grads: (n_pad, 1) f32; state: (n_pad, 128) packed slab (n_pad % tile == 0);
    wslab/bout from pack_params().  Returns (out (n_pad,1), new state slab)."""
    n_pad = state.shape[0]
    grid = (n_pad // tile,)

    out_shapes = (
        jax.ShapeDtypeStruct((n_pad, 1), jnp.float32),       # optimizer output
        jax.ShapeDtypeStruct((n_pad, GATES), jnp.float32),   # packed new state
    )

    return pl.pallas_call(
        _dm_optimizer_kernel,
        out_shape=out_shapes,
        grid=grid,
        in_specs=[
            pl.BlockSpec((tile, 1), lambda i: (i, 0)),          # grads
            pl.BlockSpec((tile, GATES), lambda i: (i, 0)),      # packed state
            pl.BlockSpec((W_ROWS, GATES), lambda i: (0, 0)),    # weight slab (resident)
            pl.BlockSpec(memory_space=pltpu.MemorySpace.SMEM),  # b_out scalar
        ],
        out_specs=(
            pl.BlockSpec((tile, 1), lambda i: (i, 0)),
            pl.BlockSpec((tile, GATES), lambda i: (i, 0)),
        ),
        input_output_aliases={1: 1},   # update the packed state slab in place
        compiler_params=pltpu.CompilerParams(
            dimension_semantics=("parallel",),
            vmem_limit_bytes=40 * 1024 * 1024),
    )(grads, state, wslab, bout)


# ---------------------------------------------------------------------------
# Compatibility wrapper (unpacked PyTorch-style signature; packs per call)
# ---------------------------------------------------------------------------
def dm_optimizer_forward(grads, hidden, cell, params, *, tile_n=4096):
    """grads: (N, 1); hidden = (h0, h1); cell = (c0, c1), each (N, HIDDEN)."""
    n = grads.shape[0]
    tile = _choose_tile(n, tile_n)
    n_pad = _round_up(n, tile)

    state = pack_state(hidden, cell, n_pad)
    grads_p = jnp.pad(grads.astype(jnp.float32), ((0, n_pad - n), (0, 0)))
    wslab, bout = pack_params(params)

    out_p, state_new = dm_optimizer_step(grads_p, state, wslab, bout, tile=tile)
    (h0n, h1n), (c0n, c1n) = unpack_state(state_new, n)
    return out_p[:n], (h0n, h1n), (c0n, c1n)


# ---------------------------------------------------------------------------
# Init + plain-JAX reference (PyTorch LSTMCell semantics)
# ---------------------------------------------------------------------------
def init_params(key, hidden=HIDDEN):
    """Deterministic init mirroring PyTorch LSTMCell / Linear uniform init."""
    ks = jax.random.split(key, 10)
    bound = 1.0 / np.sqrt(hidden)

    def u(k, shape, b):
        return jax.random.uniform(k, shape, jnp.float32, minval=-b, maxval=b)

    return {
        "w_ih0": u(ks[0], (4 * hidden, 1), bound),
        "w_hh0": u(ks[1], (4 * hidden, hidden), bound),
        "b_ih0": u(ks[2], (4 * hidden,), bound),
        "b_hh0": u(ks[3], (4 * hidden,), bound),
        "w_ih1": u(ks[4], (4 * hidden, hidden), bound),
        "w_hh1": u(ks[5], (4 * hidden, hidden), bound),
        "b_ih1": u(ks[6], (4 * hidden,), bound),
        "b_hh1": u(ks[7], (4 * hidden,), bound),
        "w_out": u(ks[8], (1, hidden), bound),
        "b_out": u(ks[9], (1,), bound),
    }


def _reference_forward(grads, hidden, cell, params):
    H = HIDDEN

    def cell_fn(x, h, c, w_ih, w_hh, b_ih, b_hh):
        gates = x @ w_ih.T + b_ih + h @ w_hh.T + b_hh
        i = jax.nn.sigmoid(gates[:, 0:H])
        f = jax.nn.sigmoid(gates[:, H:2 * H])
        g = jnp.tanh(gates[:, 2 * H:3 * H])
        o = jax.nn.sigmoid(gates[:, 3 * H:4 * H])
        c_new = f * c + i * g
        return o * jnp.tanh(c_new), c_new

    h0, c0 = cell_fn(grads, hidden[0], cell[0],
                     params["w_ih0"], params["w_hh0"],
                     params["b_ih0"], params["b_hh0"])
    h1, c1 = cell_fn(h0, hidden[1], cell[1],
                     params["w_ih1"], params["w_hh1"],
                     params["b_ih1"], params["b_hh1"])
    out = h1 @ params["w_out"].T + params["b_out"]
    return out, (h0, h1), (c0, c1)


# TODO(synk): preproc=True branch of the PyTorch module is dead code (the
# constructor hard-codes preproc=False), so it is intentionally not lowered.
# ---------------------------------------------------------------------------
if __name__ == "__main__":
    key = jax.random.PRNGKey(0)
    k_param, k_g, k_h0, k_h1, k_c0, k_c1 = jax.random.split(key, 6)
    params = init_params(k_param)

    fwd = jax.jit(dm_optimizer_forward, static_argnames=("tile_n",))
    step = jax.jit(dm_optimizer_step, static_argnames=("tile",))

    def make_inputs(n):
        grads = jax.random.normal(k_g, (n, 1), jnp.float32)
        hidden = (jax.random.normal(k_h0, (n, HIDDEN), jnp.float32),
                  jax.random.normal(k_h1, (n, HIDDEN), jnp.float32))
        cell = (jax.random.normal(k_c0, (n, HIDDEN), jnp.float32),
                jax.random.normal(k_c1, (n, HIDDEN), jnp.float32))
        return grads, hidden, cell

    def assert_close(a, b):
        np.testing.assert_allclose(np.asarray(a), np.asarray(b),
                                   rtol=1e-5, atol=1e-5)

    def check_compat(n, tile_n):
        grads, hidden, cell = make_inputs(n)
        out, (h0n, h1n), (c0n, c1n) = fwd(grads, hidden, cell, params,
                                          tile_n=tile_n)
        jax.block_until_ready((out, h0n, h1n, c0n, c1n))
        ro, (rh0, rh1), (rc0, rc1) = _reference_forward(grads, hidden, cell, params)
        assert_close(out, ro)
        assert_close(h0n, rh0); assert_close(h1n, rh1)
        assert_close(c0n, rc0); assert_close(c1n, rc1)

    # 1) Compatibility wrapper: single-step tiny case, multi-step case with
    #    padded edge rows, and a >=2048-row case exercising the 2-step
    #    ("both v7x TensorCores") tile split.
    check_compat(8, 4096)
    check_compat(200, 64)
    check_compat(2500, 4096)

    # 2) Persistent packed-state path (the recommended training-loop usage):
    #    pack once, run several steps reusing the aliased slab, unpack once.
    n = 300
    grads, hidden, cell = make_inputs(n)
    tile = _choose_tile(n, 128)                 # force a multi-step grid
    n_pad = _round_up(n, tile)
    wslab, bout = pack_params(params)
    state = pack_state(hidden, cell, n_pad)
    grads_p = jnp.pad(grads.astype(jnp.float32), ((0, n_pad - n), (0, 0)))

    ref_h, ref_c = hidden, cell
    for _ in range(3):
        out_p, state = step(grads_p, state, wslab, bout, tile=tile)
        ref_out, ref_h, ref_c = _reference_forward(grads, ref_h, ref_c, params)
        assert_close(out_p[:n], ref_out)
    jax.block_until_ready(state)
    (h0n, h1n), (c0n, c1n) = unpack_state(state, n)
    assert_close(h0n, ref_h[0]); assert_close(h1n, ref_h[1])
    assert_close(c0n, ref_c[0]); assert_close(c1n, ref_c[1])

    print("KERNEL_OK")
</pallas_src>

<mosaic_0001>
module attributes {stable_mosaic.version = 11 : i64} {
  func.func @_dm_optimizer_kernel(%arg0: i32, %arg1: memref<8x1xf32, #tpu.memory_space<vmem>>, %arg2: memref<8x128xf32, #tpu.memory_space<vmem>>, %arg3: memref<104x128xf32, #tpu.memory_space<vmem>>, %arg4: memref<1xf32, #tpu.memory_space<smem>>, %arg5: memref<8x1xf32, #tpu.memory_space<vmem>>, %arg6: memref<8x128xf32, #tpu.memory_space<vmem>>) attributes {dimension_semantics = [#tpu.dimension_semantics<parallel>], iteration_bounds = array<i64: 1>, scalar_prefetch = 0 : i64, scratch_operands = 0 : i64, tpu.core_type = #tpu.core_type<tc>, window_params = [{transform_indices = @transform_0, window_bounds = array<i64: 8, 1>}, {transform_indices = @transform_1, window_bounds = array<i64: 8, 128>}, {pipeline_mode = #tpu.pipeline_mode<synchronous>, transform_indices = @transform_2, window_bounds = array<i64: 104, 128>}, {transform_indices = @transform_3, window_bounds = array<i64: 1>}, {transform_indices = @transform_4, window_bounds = array<i64: 8, 1>}, {transform_indices = @transform_5, window_bounds = array<i64: 8, 128>}]} {
    %c0 = arith.constant 0 : index
    %c0_0 = arith.constant 0 : index
    %0 = vector.load %arg1[%c0, %c0_0] : memref<8x1xf32, #tpu.memory_space<vmem>>, vector<8x1xf32>
    %c0_1 = arith.constant 0 : index
    %c0_2 = arith.constant 0 : index
    %1 = vector.load %arg2[%c0_1, %c0_2] : memref<8x128xf32, #tpu.memory_space<vmem>>, vector<8x128xf32>
    %2 = vector.extract_strided_slice %1 {offsets = [0, 0], sizes = [8, 32], strides = [1, 1]} : vector<8x128xf32> to vector<8x32xf32>
    %3 = vector.extract_strided_slice %1 {offsets = [0, 32], sizes = [8, 32], strides = [1, 1]} : vector<8x128xf32> to vector<8x32xf32>
    %4 = vector.extract_strided_slice %1 {offsets = [0, 64], sizes = [8, 32], strides = [1, 1]} : vector<8x128xf32> to vector<8x32xf32>
    %5 = vector.extract_strided_slice %1 {offsets = [0, 96], sizes = [8, 32], strides = [1, 1]} : vector<8x128xf32> to vector<8x32xf32>
    %c0_3 = arith.constant 0 : index
    %c0_4 = arith.constant 0 : index
    %6 = vector.load %arg3[%c0_3, %c0_4] : memref<104x128xf32, #tpu.memory_space<vmem>>, vector<32x128xf32>
    %c32 = arith.constant 32 : index
    %c0_5 = arith.constant 0 : index
    %7 = vector.load %arg3[%c32, %c0_5] : memref<104x128xf32, #tpu.memory_space<vmem>>, vector<64x128xf32>
    %c96 = arith.constant 96 : index
    %c0_6 = arith.constant 0 : index
    %8 = vector.load %arg3[%c96, %c0_6] : memref<104x128xf32, #tpu.memory_space<vmem>>, vector<1x128xf32>
    %c97 = arith.constant 97 : index
    %c0_7 = arith.constant 0 : index
    %9 = vector.load %arg3[%c97, %c0_7] : memref<104x128xf32, #tpu.memory_space<vmem>>, vector<1x128xf32>
    %c98 = arith.constant 98 : index
    %c0_8 = arith.constant 0 : index
    %10 = vector.load %arg3[%c98, %c0_8] : memref<104x128xf32, #tpu.memory_space<vmem>>, vector<1x128xf32>
    %c99 = arith.constant 99 : index
    %c0_9 = arith.constant 0 : index
    %11 = vector.load %arg3[%c99, %c0_9] : memref<104x128xf32, #tpu.memory_space<vmem>>, vector<1x32xf32>
    %12 = vector.broadcast %0 : vector<8x1xf32> to vector<8x128xf32>
    %13 = vector.broadcast %10 : vector<1x128xf32> to vector<8x128xf32>
    %14 = arith.mulf %12, %13 : vector<8x128xf32>
    %cst = arith.constant dense<0.000000e+00> : vector<8x128xf32>
    %15 = tpu.matmul %2, %6, %cst {dimension_numbers = #tpu.dot_dimension_numbers<[1], [0], [0], [1], [0, 0, 1, 1], [], []>} : vector<8x32xf32>, vector<32x128xf32>, vector<8x128xf32> -> vector<8x128xf32>
    %16 = arith.addf %14, %15 : vector<8x128xf32>
    %17 = vector.broadcast %8 : vector<1x128xf32> to vector<8x128xf32>
    %18 = arith.addf %16, %17 : vector<8x128xf32>
    %19 = math.tanh %18 : vector<8x128xf32>
    %20 = vector.extract_strided_slice %19 {offsets = [0, 0], sizes = [8, 32], strides = [1, 1]} : vector<8x128xf32> to vector<8x32xf32>
    %cst_10 = arith.constant 1.000000e+00 : f32
    %21 = vector.broadcast %cst_10 : f32 to vector<8x32xf32>
    %22 = arith.addf %20, %21 : vector<8x32xf32>
    %cst_11 = arith.constant 5.000000e-01 : f32
    %23 = vector.broadcast %cst_11 : f32 to vector<8x32xf32>
    %24 = arith.mulf %23, %22 : vector<8x32xf32>
    %25 = vector.extract_strided_slice %19 {offsets = [0, 32], sizes = [8, 32], strides = [1, 1]} : vector<8x128xf32> to vector<8x32xf32>
    %cst_12 = arith.constant 1.000000e+00 : f32
    %26 = vector.broadcast %cst_12 : f32 to vector<8x32xf32>
    %27 = arith.addf %25, %26 : vector<8x32xf32>
    %cst_13 = arith.constant 5.000000e-01 : f32
    %28 = vector.broadcast %cst_13 : f32 to vector<8x32xf32>
    %29 = arith.mulf %28, %27 : vector<8x32xf32>
    %30 = vector.extract_strided_slice %19 {offsets = [0, 64], sizes = [8, 32], strides = [1, 1]} : vector<8x128xf32> to vector<8x32xf32>
    %31 = vector.extract_strided_slice %19 {offsets = [0, 96], sizes = [8, 32], strides = [1, 1]} : vector<8x128xf32> to vector<8x32xf32>
    %cst_14 = arith.constant 1.000000e+00 : f32
    %32 = vector.broadcast %cst_14 : f32 to vector<8x32xf32>
    %33 = arith.addf %31, %32 : vector<8x32xf32>
    %cst_15 = arith.constant 5.000000e-01 : f32
    %34 = vector.broadcast %cst_15 : f32 to vector<8x32xf32>
    %35 = arith.mulf %34, %33 : vector<8x32xf32>
    %36 = arith.mulf %29, %4 : vector<8x32xf32>
    %37 = arith.mulf %24, %30 : vector<8x32xf32>
    %38 = arith.addf %36, %37 : vector<8x32xf32>
    %39 = math.tanh %38 : vector<8x32xf32>
    %40 = arith.mulf %35, %39 : vector<8x32xf32>
    %41 = tpu.concatenate %40, %3 in 1 : vector<8x32xf32>, vector<8x32xf32> -> vector<8x64xf32>
    %cst_16 = arith.constant dense<0.000000e+00> : vector<8x128xf32>
    %42 = tpu.matmul %41, %7, %cst_16 {dimension_numbers = #tpu.dot_dimension_numbers<[1], [0], [0], [1], [0, 0, 1, 1], [], []>} : vector<8x64xf32>, vector<64x128xf32>, vector<8x128xf32> -> vector<8x128xf32>
    %43 = vector.broadcast %9 : vector<1x128xf32> to vector<8x128xf32>
    %44 = arith.addf %42, %43 : vector<8x128xf32>
    %45 = math.tanh %44 : vector<8x128xf32>
    %46 = vector.extract_strided_slice %45 {offsets = [0, 0], sizes = [8, 32], strides = [1, 1]} : vector<8x128xf32> to vector<8x32xf32>
    %cst_17 = arith.constant 1.000000e+00 : f32
    %47 = vector.broadcast %cst_17 : f32 to vector<8x32xf32>
    %48 = arith.addf %46, %47 : vector<8x32xf32>
    %cst_18 = arith.constant 5.000000e-01 : f32
    %49 = vector.broadcast %cst_18 : f32 to vector<8x32xf32>
    %50 = arith.mulf %49, %48 : vector<8x32xf32>
    %51 = vector.extract_strided_slice %45 {offsets = [0, 32], sizes = [8, 32], strides = [1, 1]} : vector<8x128xf32> to vector<8x32xf32>
    %cst_19 = arith.constant 1.000000e+00 : f32
    %52 = vector.broadcast %cst_19 : f32 to vector<8x32xf32>
    %53 = arith.addf %51, %52 : vector<8x32xf32>
    %cst_20 = arith.constant 5.000000e-01 : f32
    %54 = vector.broadcast %cst_20 : f32 to vector<8x32xf32>
    %55 = arith.mulf %54, %53 : vector<8x32xf32>
    %56 = vector.extract_strided_slice %45 {offsets = [0, 64], sizes = [8, 32], strides = [1, 1]} : vector<8x128xf32> to vector<8x32xf32>
    %57 = vector.extract_strided_slice %45 {offsets = [0, 96], sizes = [8, 32], strides = [1, 1]} : vector<8x128xf32> to vector<8x32xf32>
    %cst_21 = arith.constant 1.000000e+00 : f32
    %58 = vector.broadcast %cst_21 : f32 to vector<8x32xf32>
    %59 = arith.addf %57, %58 : vector<8x32xf32>
    %cst_22 = arith.constant 5.000000e-01 : f32
    %60 = vector.broadcast %cst_22 : f32 to vector<8x32xf32>
    %61 = arith.mulf %60, %59 : vector<8x32xf32>
    %62 = arith.mulf %55, %5 : vector<8x32xf32>
    %63 = arith.mulf %50, %56 : vector<8x32xf32>
    %64 = arith.addf %62, %63 : vector<8x32xf32>
    %65 = math.tanh %64 : vector<8x32xf32>
    %66 = arith.mulf %61, %65 : vector<8x32xf32>
    %67 = vector.broadcast %11 : vector<1x32xf32> to vector<8x32xf32>
    %68 = arith.mulf %66, %67 : vector<8x32xf32>
    %cst_23 = arith.constant dense<0.000000e+00> : vector<8xf32>
    %69 = vector.multi_reduction <add>, %68, %cst_23 [1] : vector<8x32xf32> to vector<8xf32>
    %70 = vector.shape_cast %69 : vector<8xf32> to vector<8x1xf32>
    %c0_24 = arith.constant 0 : index
    %71 = memref.load %arg4[%c0_24] : memref<1xf32, #tpu.memory_space<smem>>
    %72 = vector.broadcast %71 : f32 to vector<8x1xf32>
    %73 = arith.addf %70, %72 : vector<8x1xf32>
    %c0_25 = arith.constant 0 : index
    %c0_26 = arith.constant 0 : index
    %74 = vector.load %arg5[%c0_25, %c0_26] : memref<8x1xf32, #tpu.memory_space<vmem>>, vector<8x1xf32>
    tpu.vector_store %arg5[%c0_25, %c0_26], %73 {strides = array<i32>} : memref<8x1xf32, #tpu.memory_space<vmem>>, vector<8x1xf32>,
    %75 = tpu.concatenate %40, %66, %38, %64 in 1 : vector<8x32xf32>, vector<8x32xf32>, vector<8x32xf32>, vector<8x32xf32> -> vector<8x128xf32>
    %c0_27 = arith.constant 0 : index
    %c0_28 = arith.constant 0 : index
    %76 = vector.load %arg6[%c0_27, %c0_28] : memref<8x128xf32, #tpu.memory_space<vmem>>, vector<8x128xf32>
    tpu.vector_store %arg6[%c0_27, %c0_28], %75 {strides = array<i32>} : memref<8x128xf32, #tpu.memory_space<vmem>>, vector<8x128xf32>,
    return
  }
  func.func @transform_0(%arg0: i32) -> (i32, i32) {
    %c0_i32 = arith.constant 0 : i32
    %c0_i32_0 = arith.constant 0 : i32
    return %arg0, %c0_i32 : i32, i32
  }
  func.func @transform_1(%arg0: i32) -> (i32, i32) {
    %c0_i32 = arith.constant 0 : i32
    %c0_i32_0 = arith.constant 0 : i32
    return %arg0, %c0_i32 : i32, i32
  }
  func.func @transform_2(%arg0: i32) -> (i32, i32) {
    %c0_i32 = arith.constant 0 : i32
    %c0_i32_0 = arith.constant 0 : i32
    %c0_i32_1 = arith.constant 0 : i32
    return %c0_i32, %c0_i32_0 : i32, i32
  }
  func.func @transform_3(%arg0: i32) -> i32 {
    %c0_i32 = arith.constant 0 : i32
    %c0_i32_0 = arith.constant 0 : i32
    return %c0_i32 : i32
  }
  func.func @transform_4(%arg0: i32) -> (i32, i32) {
    %c0_i32 = arith.constant 0 : i32
    %c0_i32_0 = arith.constant 0 : i32
    return %arg0, %c0_i32 : i32, i32
  }
  func.func @transform_5(%arg0: i32) -> (i32, i32) {
    %c0_i32 = arith.constant 0 : i32
    %c0_i32_0 = arith.constant 0 : i32
    return %arg0, %c0_i32 : i32, i32
  }
}

</mosaic_0001>

<bundles_post_ra>
// kernel: dm_optimizer_forward.1
= control target key start
LH: loop header
LB: loop body
LE: loop exit
PB: predicated region body
PF: predicated region fallthrough
CT: control target
= control target key end

     0   :  { %v368_v0 = vmov 0.0   ;;  %vm369_vm0 = vmmov 0   ;;  %v370_v3 = vmov 0   ;;  %s371_s28 = smov 96   ;;  %vm48_vm1 = vcmask 261120   ;;  %s372_s8 = smov 64   ;;  %s509_s2 = inlined_call_operand.vmem [shape: f32[104,128], index: 2, kind: input, shape index: {}]   ;;  %s510_s1 = inlined_call_operand.vmem [shape: f32[8,128], index: 1, kind: input, shape index: {}, may-alias: {1,5}]   ;;  %s511_s0 = inlined_call_operand.vmem [shape: f32[8,1], index: 0, kind: input, shape index: {}]   ;;  %s512_s5 = inlined_call_operand.vmem [shape: f32[8,128], index: 5, kind: output, shape index: {1}, may-alias: {1,5}]   ;;  %s513_s3 = inlined_call_operand.<no memory space> [shape: f32[1], index: 3, kind: input, shape index: {}]   ;;  %s514_s4 = inlined_call_operand.vmem [shape: f32[8,1], index: 4, kind: output, shape index: {0}]  }
   0x1   :  { %323 = vmatprep.subr.mxu0 %v368_v0  ;;  %v25_v1 = vld [vmem:[%s509_s2 + $0x18] sm:$0xff]  ;;  %v24_v2 = vld [vmem:[%s509_s2 + $0x10] sm:$0xff]  ;;  %331 = vmatprep.mubr.msk.f32.mxu0 %vm369_vm0, %v368_v0  ;;  %v20_v4 = vld [vmem:[%s511_s0] sm:$0xff]  ;;  %s373_s9 = smov 32   ;;  %vm160_vm2 = vcmask 523264   ;;  %vm292_vm3 = vcmask 785408  }
   0x2   :  { %324 = vmatpush3.msra.mxu0 %v25_v1  ;;  %359 = vset.pattern.permute.xlu0 %v370_v3  ;;  %v23_v5 = vld [vmem:[%s509_s2 + $0x8] sm:$0xff]  ;;  %v423_v6 = vld [vmem:[%s510_s1] sm:$0xff]  ;;  %v33_v25 = vld [vmem:[%s509_s2 + $0x58] sm:$0xff]  ;;  %v274_v1 = vstv %s513_s3  ;;  %vm276_vm4 = vcmask 7168  }
   0x3   :  { %325 = vmatprep.subr.mxu0 %v368_v0  ;;  %40 = vperm.xlu0 %359, %v20_v4   ;;  %v22_v7 = vld [vmem:[%s509_s2] sm:$0xff]  ;;  %v32_v26 = vld [vmem:[%s509_s2 + $0x50] sm:$0xff]  ;;  %v31_v27 = vld [vmem:[%s509_s2 + $0x48] sm:$0xff] }
   0x4   :  { %326 = vmatpush3.msra.mxu0 %v24_v2  ;;  %131 = vrot.lane.b32.xlu1 %v423_v6, %s371_s28  ;;  %v303_v8 = vld [vmem:[%s509_s2 + $0x62] ss:$0 sm:$0xff]  ;;  %v305_v11 = vld [vmem:[%s509_s2 + $0x60] ss:$0 sm:$0xff]  ;;  %v29_v29 = vld [vmem:[%s509_s2 + $0x38] sm:$0xff] }
   0x5   :  { %327 = vmatprep.subr.mxu0 %v368_v0  ;;  %334 = vmatprep.subr.mxu1 %v368_v0  ;;  %v30_v28 = vld [vmem:[%s509_s2 + $0x40] sm:$0xff]  ;;  %v28_v30 = vld [vmem:[%s509_s2 + $0x30] sm:$0xff]  ;;  %v27_v32 = vld [vmem:[%s509_s2 + $0x28] sm:$0xff] }
   0x6   :  { %328 = vmatpush3.msra.mxu0 %v23_v5  ;;  %350 = vmatprep.mubr.msk.f32.mxu1 %vm369_vm0, %v368_v0  ;;  %v26_v33 = vld [vmem:[%s509_s2 + $0x20] sm:$0xff] }
   0x7   :  { %329 = vmatprep.subr.mxu0 %v368_v0  ;;  %335 = vmatpush3.msra.mxu1 %v33_v25  ;;  %v306_v38 = vld [vmem:[%s509_s2 + $0x61] ss:$0 sm:$0xff]  ;;  %v308_v47 = vld [vmem:[%s509_s2 + $0x63] ss:$0 sm:$0xff] }
   0x8   :  { %330 = vmatpush3.msra.mxu0 %v22_v7  ;;  %336 = vmatprep.subr.mxu1 %v368_v0 }
   0x9   :  { %332 = vmatmul.mubr.msk.f32.vlgmr.msra.gmra.mxu0 %vm48_vm1, %v423_v6  ;;  %337 = vmatpush3.msra.mxu1 %v32_v26 }
   0xa   :  { %338 = vmatprep.subr.mxu1 %v368_v0 }
   0xb   :  { %339 = vmatpush3.msra.mxu1 %v31_v27 }
   0xc   :  { %340 = vmatprep.subr.mxu1 %v368_v0 }
   0xd   :  { %341 = vmatpush3.msra.mxu1 %v30_v28 }
   0xe   :  { %342 = vmatprep.subr.mxu1 %v368_v0 }
   0xf   :  { %343 = vmatpush3.msra.mxu1 %v29_v29 }
  0x10   :  { %344 = vmatprep.subr.mxu1 %v368_v0 }
  0x11   :  { %345 = vmatpush3.msra.mxu1 %v28_v30 }
  0x12   :  { %346 = vmatprep.subr.mxu1 %v368_v0 }
  0x13   :  { %347 = vmatpush3.msra.mxu1 %v27_v32 }
  0x14   :  { %348 = vmatprep.subr.mxu1 %v368_v0 }
  0x15   :  { %349 = vmatpush3.msra.mxu1 %v26_v33 }
  0x76   :  { %v132_v21 = vpop.permute.xlu1 %131 }
  0x7e   :  { %v41_v9 = vpop.permute.xlu0 %40 }
  0x7f   :  { %v47_v10 = vmul.f32 %v303_v8, %v41_v9 }
  0xc9   :  { %v118_v12 = vpop.f32.mrf.mxu0 }
  0xca   :  { %v122_v13 = vadd.f32 %v118_v12, %v47_v10 }
  0xcb   :  { %v333_v14 = vpop.f32.mrf.mxu0 }
  0xcc   :  { %v127_v15 = vadd.f32 %v305_v11, %v122_v13 }
  0xce   :  { %360 = vtanh.f32 %v127_v15 }
  0xdb   :  { %v361_v16 = vpop.eup %360 }
  0xdc   :  { %136 = vrot.lane.b32.xlu0 %v361_v16, %s372_s8  ;;  %v129_v17 = vadd.f32 1.0, %v361_v16 }
  0xde   :  { %v130_v18 = vmul.f32 0.5, %v129_v17 }
  0xe0   :  { %v134_v22 = vmul.f32 %v132_v21, %v130_v18 }
 0x14e   :  { %v137_v19 = vpop.permute.xlu0 %136 }
 0x14f   :  { %v139_v20 = vmul.f32 %v137_v19, %v130_v18 }
 0x151   :  { %141 = vrot.lane.b32.xlu1 %v139_v20, %s373_s9 }
 0x1c3   :  { %v142_v23 = vpop.permute.xlu1 %141 }
 0x1c4   :  { %v144_v24 = vadd.f32 %v142_v23, %v134_v22 }
 0x1c6   :  { %362 = vtanh.f32 %v144_v24 }
 0x1d3   :  { %v363_v31 = vpop.eup %362 }
 0x1d4   :  { %147 = vrot.lane.b32.xlu0 %v363_v31, %s372_s8 }
 0x246   :  { %v148_v34 = vpop.permute.xlu0 %147 }
 0x247   :  { %v150_v35 = vmul.f32 %v148_v34, %v130_v18 }
 0x249   :  { %152 = vrot.lane.b32.xlu1 %v150_v35, %s373_s9 }
 0x24d   :  { %237 = vrot.lane.b32.xlu1 %v423_v6, %s372_s8 }
 0x2bb   :  { %v153_v36 = vpop.permute.xlu1 %152 }
 0x2bc   :  { %v155_v37 = vsel %vm48_vm1, %v153_v36, %v423_v6 }
 0x2bd   :  { %351 = vmatmul.mubr.msk.f32.vlgmr.msra.gmra.mxu1 %vm160_vm2, %v155_v37 }
 0x2bf   :  { %v238_v48 = vpop.permute.xlu1 %237 }
 0x37d   :  { %v230_v39 = vpop.f32.mrf.mxu1 }
 0x37e   :  { %v231_v40 = vadd.f32 %v306_v38, %v230_v39 }
 0x37f   :  { %v352_v41 = vpop.f32.mrf.mxu1 }
 0x380   :  { %364 = vtanh.f32 %v231_v40 }
 0x38d   :  { %v365_v42 = vpop.eup %364 }
 0x38e   :  { %242 = vrot.lane.b32.xlu0 %v365_v42, %s372_s8  ;;  %v235_v43 = vadd.f32 1.0, %v365_v42 }
 0x390   :  { %v236_v44 = vmul.f32 0.5, %v235_v43 }
 0x392   :  { %v240_v49 = vmul.f32 %v238_v48, %v236_v44 }
 0x400   :  { %v243_v45 = vpop.permute.xlu0 %242 }
 0x401   :  { %v245_v46 = vmul.f32 %v243_v45, %v236_v44 }
 0x403   :  { %247 = vrot.lane.b32.xlu0 %v245_v46, %s373_s9 }
 0x407   :  { %262 = vrot.lane.b32.xlu0 %v308_v47, %s371_s28 }
 0x475   :  { %v248_v50 = vpop.permute.xlu0 %247 }
 0x476   :  { %v250_v51 = vadd.f32 %v248_v50, %v240_v49 }
 0x478   :  { %366 = vtanh.f32 %v250_v51 }
 0x479   :  { %v263_v54 = vpop.permute.xlu0 %262 }
 0x485   :  { %v367_v52 = vpop.eup %366 }
 0x486   :  { %253 = vrot.lane.b32.xlu1 %v367_v52, %s372_s8 }
 0x4f8   :  { %v254_v53 = vpop.permute.xlu1 %253 }
 0x4f9   :  { %v256_v55 = vmul.f32 %v254_v53, %v236_v44 }
 0x4fb   :  { %v265_v56 = vmul.f32 %v263_v54, %v256_v55 }
 0x4fd   :  { %267 = vrot.lane.b32.xlu1 %v265_v56, %s373_s9 }
 0x501   :  { %279 = vrot.lane.b32.xlu1 %v256_v55, %s372_s8 }
 0x505   :  { %283 = vrot.lane.b32.xlu1 %v144_v24, %s373_s9 }
 0x509   :  { %287 = vrot.lane.b32.xlu1 %v250_v51, %s372_s8 }
 0x56f   :  { %v268_v57 = vpop.permute.xlu1 %267 }
 0x570   :  { %v270_v58 = vsel %vm48_vm1, %v268_v57, 0.0 }
 0x571   :  { %271 = vadd.xlane.f32.xlu0 %v270_v58 }
 0x573   :  { %v280_v59 = vpop.permute.xlu1 %279 }
 0x574   :  { %v290_v61 = vsel %vm48_vm1, %v153_v36, %v280_v59 }
 0x577   :  { %v284_v60 = vpop.permute.xlu1 %283 }
 0x578   :  { %v291_v62 = vsel %vm160_vm2, %v290_v61, %v284_v60 }
 0x57b   :  { %v288_v63 = vpop.permute.xlu1 %287 }
 0x57c   :  { %v293_v0 = vsel %vm292_vm3, %v291_v62, %v288_v63 }
 0x57d   :  { %294 = vst [vmem:[%s512_s5] sm:$0xff] %v293_v0 }
 0x5fa   :  { %v272_v2 = vpop.xlane.xlu0 %271 }
 0x5fb   :  { %v275_v3 = vadd.f32 %v274_v1, %v272_v2 }
 0x5fd   :  { %277 = vst.msk [vmem:[%s514_s4] sm:$0xff] %vm276_vm4, %v275_v3 }

</bundles_post_ra>
